<compile_context>
chip_gen: v6e
topology: v6e:2x2x1
jax: 0.10.0
libtpu: 0.0.40
codegen_flags: <defaults>
</compile_context>

<pallas_src>
import functools

import jax
import jax.numpy as jnp
from jax import lax
from jax.experimental import pallas as pl
from jax.experimental.pallas import tpu as pltpu

BN_EPS = 1e-5            # torch.nn.BatchNorm1d default eps

TB_MAX = 256             # batch tile (multiple of 8)
TF_MAX = 1024            # feature tile (multiple of 128)
VMEM_LIMIT_BYTES = 40 << 20


def _ch_kernel_onehot(S, x_ref, age_n_ref, gender_ref, site_ref, p_ref,
                      x_ch_ref, age_x_ref, gender_x_ref, eps_ref,
                      gamma_ref, delta_ref):
    # Stacked-parameter row layout:
    #   0 alpha | 1 age_w | 2 age_b | 3 gender_w | 4 gender_b
    #   5      : 5+S     -> gamma_w + gamma_b
    #   5+S    : 5+2S    -> exp(delta_w + delta_b)
    #   5+2S   : 5+3S    -> 1 / exp(delta_w + delta_b)
    site = site_ref[...]                                   # [TB, S] one-hot
    alpha = p_ref[0:1, :]                                  # [1, TF]

    # Linear(1,F): degenerate K=1 contraction -> broadcast multiply on the VPU.
    age_x = age_n_ref[...] * p_ref[1:2, :] + p_ref[2:3, :]
    age_x_ref[...] = age_x
    gender_x = gender_ref[...] * p_ref[3:4, :] + p_ref[4:5, :]
    gender_x_ref[...] = gender_x

    # Tiny K=S MXU contractions; exp/reciprocal were hoisted into the tables.
    gamma = jnp.dot(site, p_ref[5:5 + S, :], preferred_element_type=jnp.float32)
    gamma_ref[...] = gamma
    delta = jnp.dot(site, p_ref[5 + S:5 + 2 * S, :],
                    preferred_element_type=jnp.float32)
    delta_ref[...] = delta
    inv_delta = jnp.dot(site, p_ref[5 + 2 * S:5 + 3 * S, :],
                        preferred_element_type=jnp.float32)

    eps = (x_ref[...] - alpha - age_x - gender_x - gamma) * inv_delta
    eps_ref[...] = eps
    x_ch_ref[...] = alpha + eps


def _ch_kernel_generic(S, x_ref, age_n_ref, gender_ref, site_ref, p_ref,
                       x_ch_ref, age_x_ref, gender_x_ref, eps_ref,
                       gamma_ref, delta_ref):
    # Arbitrary (possibly non-one-hot) 2-D site encodings: exact in-kernel
    # exp + reciprocal, matching the PyTorch math for any `site`.
    # Stacked-parameter row layout:
    #   0 alpha | 1 age_w | 2 age_b | 3 gender_w | 4 gender_b
    #   5 gamma_b | 6 delta_b | 7:7+S gamma_w | 7+S:7+2S delta_w
    site = site_ref[...]
    alpha = p_ref[0:1, :]

    age_x = age_n_ref[...] * p_ref[1:2, :] + p_ref[2:3, :]
    age_x_ref[...] = age_x
    gender_x = gender_ref[...] * p_ref[3:4, :] + p_ref[4:5, :]
    gender_x_ref[...] = gender_x

    gamma = jnp.dot(site, p_ref[7:7 + S, :],
                    preferred_element_type=jnp.float32) + p_ref[5:6, :]
    gamma_ref[...] = gamma
    delta = jnp.exp(jnp.dot(site, p_ref[7 + S:7 + 2 * S, :],
                            preferred_element_type=jnp.float32) + p_ref[6:7, :])
    delta_ref[...] = delta
    inv_delta = pl.reciprocal(delta, approx=False)

    eps = (x_ref[...] - alpha - age_x - gender_x - gamma) * inv_delta
    eps_ref[...] = eps
    x_ch_ref[...] = alpha + eps


def _pick_tiles(B, F):
    """(8,128)-aligned tiles, VMEM-safe, with >=2 grid blocks when possible."""
    TB = B if B <= TB_MAX else TB_MAX
    TF = F if F <= TF_MAX else TF_MAX
    if pl.cdiv(B, TB) * pl.cdiv(F, TF) < 2:
        # v7x has 2 TensorCores; a (1,1) grid would leave one idle.
        if F > 128:
            TF = 128 * pl.cdiv(pl.cdiv(F, 2), 128)
        elif B > 8:
            TB = 8 * pl.cdiv(pl.cdiv(B, 2), 8)
    return TB, TF


def ch_forward(params, x, age, gender, site):
    """Pallas implementation of CH.forward. Returns the same dict of tensors."""
    B, F = x.shape
    S = params["gamma_w"].shape[0]
    f32 = jnp.float32

    if site.ndim == 1:
        site2d = jax.nn.one_hot(site, S, dtype=f32)
        one_hot = True
    elif site.ndim == 2:
        site2d = site.astype(f32)
        one_hot = False
    else:
        raise ValueError("invalid shape for site: {}".format(site.shape))

    # BatchNorm1d(1), training mode, hoisted out of the kernel (full-batch
    # statistics; keeping it inside would be wrong once B is tiled).
    mean = jnp.mean(age, axis=0, keepdims=True)
    var = jnp.mean((age - mean) ** 2, axis=0, keepdims=True)
    age_n = (age - mean) * lax.rsqrt(var + BN_EPS)
    age_n = age_n * params["bn_w"] + params["bn_b"]        # [B, 1]

    vec = lambda v: v.reshape(1, F).astype(f32)
    alpha2d = params["alpha"].reshape(1, F).astype(f32)

    if one_hot:
        # Algebraic hoist (valid for strictly one-hot site rows):
        #   delta = exp(site @ Wd + bd) = site @ exp(Wd + bd)
        exp_tab = jnp.exp(params["delta_w"].astype(f32) + vec(params["delta_b"]))
        stacked = jnp.concatenate([
            alpha2d,
            vec(params["age_w"]), vec(params["age_b"]),
            vec(params["gender_w"]), vec(params["gender_b"]),
            params["gamma_w"].astype(f32) + vec(params["gamma_b"]),
            exp_tab,
            1.0 / exp_tab,
        ], axis=0)                                         # [5 + 3S, F]
        kernel = functools.partial(_ch_kernel_onehot, S)
        P = 5 + 3 * S
    else:
        stacked = jnp.concatenate([
            alpha2d,
            vec(params["age_w"]), vec(params["age_b"]),
            vec(params["gender_w"]), vec(params["gender_b"]),
            vec(params["gamma_b"]), vec(params["delta_b"]),
            params["gamma_w"].astype(f32),
            params["delta_w"].astype(f32),
        ], axis=0)                                         # [7 + 2S, F]
        kernel = functools.partial(_ch_kernel_generic, S)
        P = 7 + 2 * S

    TB, TF = _pick_tiles(B, F)
    grid = (pl.cdiv(B, TB), pl.cdiv(F, TF))

    bf_spec = pl.BlockSpec((TB, TF), lambda i, j: (i, j))     # [B, F] tiles
    col_spec = pl.BlockSpec((TB, 1), lambda i, j: (i, 0))     # [B, 1] tiles
    site_spec = pl.BlockSpec((TB, S), lambda i, j: (i, 0))    # [B, S] tiles
    par_spec = pl.BlockSpec((P, TF), lambda i, j: (0, j))     # stacked params

    out_shape = tuple(jax.ShapeDtypeStruct((B, F), f32) for _ in range(6))
    out_specs = tuple(bf_spec for _ in range(6))

    x_ch, age_x, gender_x, eps, gamma, delta = pl.pallas_call(
        kernel,
        out_shape=out_shape,
        grid=grid,
        in_specs=[bf_spec, col_spec, col_spec, site_spec, par_spec],
        out_specs=out_specs,
        compiler_params=pltpu.CompilerParams(
            dimension_semantics=("parallel", "parallel"),
            vmem_limit_bytes=VMEM_LIMIT_BYTES),
    )(x.astype(f32), age_n.astype(f32), gender.astype(f32), site2d, stacked)

    return {
        "x_ch": x_ch,
        "alpha": params["alpha"],
        "age": age_x,
        "gender": gender_x,
        "eps": eps,
        "gamma": gamma,
        "delta": delta,
    }


def ch_reference(params, x, age, gender, site):
    """Pure-JAX reference mirroring the PyTorch forward (training-mode BN)."""
    S = params["gamma_w"].shape[0]
    if site.ndim == 1:
        site = jax.nn.one_hot(site, S, dtype=jnp.float32)
    alpha = params["alpha"][None, :]
    mean = jnp.mean(age, axis=0, keepdims=True)
    var = jnp.mean((age - mean) ** 2, axis=0, keepdims=True)
    age_n = (age - mean) / jnp.sqrt(var + BN_EPS)
    age_n = age_n * params["bn_w"] + params["bn_b"]
    age_x = age_n @ params["age_w"] + params["age_b"]
    gender_x = gender @ params["gender_w"] + params["gender_b"]
    gamma = site @ params["gamma_w"] + params["gamma_b"]
    delta = jnp.exp(site @ params["delta_w"] + params["delta_b"])
    eps = (x - alpha - age_x - gender_x - gamma) / delta
    x_ch = alpha + eps
    return {"x_ch": x_ch, "alpha": params["alpha"], "age": age_x,
            "gender": gender_x, "eps": eps, "gamma": gamma, "delta": delta}


def init_params(key, input_size, num_sites, scale=0.1):
    # NOTE: CH.__init__ zero-initializes alpha/age/gender/gamma/delta, which
    # would make the forward degenerate (x_ch == x).  Small deterministic
    # random values of the same shapes exercise the full compute path.
    ks = jax.random.split(key, 9)
    f32 = jnp.float32
    return {
        "alpha":    scale * jax.random.normal(ks[0], (input_size,), f32),
        "bn_w":     jnp.ones((1, 1), f32),    # BatchNorm1d affine weight
        "bn_b":     jnp.zeros((1, 1), f32),   # BatchNorm1d affine bias
        "age_w":    scale * jax.random.normal(ks[1], (1, input_size), f32),
        "age_b":    scale * jax.random.normal(ks[2], (1, input_size), f32),
        "gender_w": scale * jax.random.normal(ks[3], (1, input_size), f32),
        "gender_b": scale * jax.random.normal(ks[4], (1, input_size), f32),
        "gamma_w":  scale * jax.random.normal(ks[5], (num_sites, input_size), f32),
        "gamma_b":  scale * jax.random.normal(ks[6], (1, input_size), f32),
        "delta_w":  scale * jax.random.normal(ks[7], (num_sites, input_size), f32),
        "delta_b":  scale * jax.random.normal(ks[8], (1, input_size), f32),
    }


if __name__ == "__main__":
    B, INPUT_SIZE, NUM_SITES = 8, 256, 8

    key = jax.random.PRNGKey(0)
    k_par, k_x, k_age, k_gender, k_site = jax.random.split(key, 5)

    params = init_params(k_par, INPUT_SIZE, NUM_SITES)
    x = jax.random.normal(k_x, (B, INPUT_SIZE), jnp.float32)
    age = 50.0 + 10.0 * jax.random.normal(k_age, (B, 1), jnp.float32)
    gender = jax.random.bernoulli(k_gender, 0.5, (B, 1)).astype(jnp.float32)
    site = jax.random.randint(k_site, (B,), 0, NUM_SITES, jnp.int32)

    ref = ch_reference(params, x, age, gender, site)

    # Path 1: integer site ids -> one-hot (exp/reciprocal hoisted to [S,F] tables).
    out = ch_forward(params, x, age, gender, site)
    jax.block_until_ready(out)
    for name in ("x_ch", "age", "gender", "eps", "gamma", "delta"):
        assert jnp.allclose(out[name], ref[name], rtol=1e-5, atol=1e-5), name
    assert jnp.allclose(out["alpha"], ref["alpha"])

    # Path 2: pre-encoded 2-D site (generic kernel, in-kernel exp/reciprocal).
    site2d = jax.nn.one_hot(site, NUM_SITES, dtype=jnp.float32)
    out2 = ch_forward(params, x, age, gender, site2d)
    jax.block_until_ready(out2)
    for name in ("x_ch", "age", "gender", "eps", "gamma", "delta"):
        assert jnp.allclose(out2[name], ref[name], rtol=1e-5, atol=1e-5), name

    print("KERNEL_OK")
</pallas_src>

<mosaic_0001>
module attributes {stable_mosaic.version = 11 : i64} {
  func.func @_ch_kernel_onehot(%arg0: i32, %arg1: i32, %arg2: memref<8x128xf32, #tpu.memory_space<vmem>>, %arg3: memref<8x1xf32, #tpu.memory_space<vmem>>, %arg4: memref<8x1xf32, #tpu.memory_space<vmem>>, %arg5: memref<8x8xf32, #tpu.memory_space<vmem>>, %arg6: memref<29x128xf32, #tpu.memory_space<vmem>>, %arg7: memref<8x128xf32, #tpu.memory_space<vmem>>, %arg8: memref<8x128xf32, #tpu.memory_space<vmem>>, %arg9: memref<8x128xf32, #tpu.memory_space<vmem>>, %arg10: memref<8x128xf32, #tpu.memory_space<vmem>>, %arg11: memref<8x128xf32, #tpu.memory_space<vmem>>, %arg12: memref<8x128xf32, #tpu.memory_space<vmem>>) attributes {dimension_semantics = [#tpu.dimension_semantics<parallel>, #tpu.dimension_semantics<parallel>], iteration_bounds = array<i64: 1, 2>, scalar_prefetch = 0 : i64, scratch_operands = 0 : i64, tpu.core_type = #tpu.core_type<tc>, window_params = [{transform_indices = @transform_0, window_bounds = array<i64: 8, 128>}, {transform_indices = @transform_1, window_bounds = array<i64: 8, 1>}, {transform_indices = @transform_2, window_bounds = array<i64: 8, 1>}, {transform_indices = @transform_3, window_bounds = array<i64: 8, 8>}, {transform_indices = @transform_4, window_bounds = array<i64: 29, 128>}, {transform_indices = @transform_5, window_bounds = array<i64: 8, 128>}, {transform_indices = @transform_6, window_bounds = array<i64: 8, 128>}, {transform_indices = @transform_7, window_bounds = array<i64: 8, 128>}, {transform_indices = @transform_8, window_bounds = array<i64: 8, 128>}, {transform_indices = @transform_9, window_bounds = array<i64: 8, 128>}, {transform_indices = @transform_10, window_bounds = array<i64: 8, 128>}]} {
    %c0 = arith.constant 0 : index
    %c0_0 = arith.constant 0 : index
    %0 = vector.load %arg5[%c0, %c0_0] : memref<8x8xf32, #tpu.memory_space<vmem>>, vector<8x8xf32>
    %c0_1 = arith.constant 0 : index
    %c0_2 = arith.constant 0 : index
    %1 = vector.load %arg6[%c0_1, %c0_2] : memref<29x128xf32, #tpu.memory_space<vmem>>, vector<1x128xf32>
    %c0_3 = arith.constant 0 : index
    %c0_4 = arith.constant 0 : index
    %2 = vector.load %arg3[%c0_3, %c0_4] : memref<8x1xf32, #tpu.memory_space<vmem>>, vector<8x1xf32>
    %c1 = arith.constant 1 : index
    %c0_5 = arith.constant 0 : index
    %3 = vector.load %arg6[%c1, %c0_5] : memref<29x128xf32, #tpu.memory_space<vmem>>, vector<1x128xf32>
    %4 = vector.broadcast %2 : vector<8x1xf32> to vector<8x128xf32>
    %5 = vector.broadcast %3 : vector<1x128xf32> to vector<8x128xf32>
    %6 = arith.mulf %4, %5 : vector<8x128xf32>
    %c2 = arith.constant 2 : index
    %c0_6 = arith.constant 0 : index
    %7 = vector.load %arg6[%c2, %c0_6] : memref<29x128xf32, #tpu.memory_space<vmem>>, vector<1x128xf32>
    %8 = vector.broadcast %7 : vector<1x128xf32> to vector<8x128xf32>
    %9 = arith.addf %6, %8 : vector<8x128xf32>
    %c0_7 = arith.constant 0 : index
    %c0_8 = arith.constant 0 : index
    %10 = vector.load %arg8[%c0_7, %c0_8] : memref<8x128xf32, #tpu.memory_space<vmem>>, vector<8x128xf32>
    tpu.vector_store %arg8[%c0_7, %c0_8], %9 {strides = array<i32>} : memref<8x128xf32, #tpu.memory_space<vmem>>, vector<8x128xf32>,
    %c0_9 = arith.constant 0 : index
    %c0_10 = arith.constant 0 : index
    %11 = vector.load %arg4[%c0_9, %c0_10] : memref<8x1xf32, #tpu.memory_space<vmem>>, vector<8x1xf32>
    %c3 = arith.constant 3 : index
    %c0_11 = arith.constant 0 : index
    %12 = vector.load %arg6[%c3, %c0_11] : memref<29x128xf32, #tpu.memory_space<vmem>>, vector<1x128xf32>
    %13 = vector.broadcast %11 : vector<8x1xf32> to vector<8x128xf32>
    %14 = vector.broadcast %12 : vector<1x128xf32> to vector<8x128xf32>
    %15 = arith.mulf %13, %14 : vector<8x128xf32>
    %c4 = arith.constant 4 : index
    %c0_12 = arith.constant 0 : index
    %16 = vector.load %arg6[%c4, %c0_12] : memref<29x128xf32, #tpu.memory_space<vmem>>, vector<1x128xf32>
    %17 = vector.broadcast %16 : vector<1x128xf32> to vector<8x128xf32>
    %18 = arith.addf %15, %17 : vector<8x128xf32>
    %c0_13 = arith.constant 0 : index
    %c0_14 = arith.constant 0 : index
    %19 = vector.load %arg9[%c0_13, %c0_14] : memref<8x128xf32, #tpu.memory_space<vmem>>, vector<8x128xf32>
    tpu.vector_store %arg9[%c0_13, %c0_14], %18 {strides = array<i32>} : memref<8x128xf32, #tpu.memory_space<vmem>>, vector<8x128xf32>,
    %c5 = arith.constant 5 : index
    %c0_15 = arith.constant 0 : index
    %20 = vector.load %arg6[%c5, %c0_15] : memref<29x128xf32, #tpu.memory_space<vmem>>, vector<8x128xf32>
    %cst = arith.constant dense<0.000000e+00> : vector<8x128xf32>
    %21 = tpu.matmul %0, %20, %cst {dimension_numbers = #tpu.dot_dimension_numbers<[1], [0], [0], [1], [0, 0, 1, 1], [], []>} : vector<8x8xf32>, vector<8x128xf32>, vector<8x128xf32> -> vector<8x128xf32>
    %c0_16 = arith.constant 0 : index
    %c0_17 = arith.constant 0 : index
    %22 = vector.load %arg11[%c0_16, %c0_17] : memref<8x128xf32, #tpu.memory_space<vmem>>, vector<8x128xf32>
    tpu.vector_store %arg11[%c0_16, %c0_17], %21 {strides = array<i32>} : memref<8x128xf32, #tpu.memory_space<vmem>>, vector<8x128xf32>,
    %c13 = arith.constant 13 : index
    %c0_18 = arith.constant 0 : index
    %23 = vector.load %arg6[%c13, %c0_18] : memref<29x128xf32, #tpu.memory_space<vmem>>, vector<8x128xf32>
    %cst_19 = arith.constant dense<0.000000e+00> : vector<8x128xf32>
    %24 = tpu.matmul %0, %23, %cst_19 {dimension_numbers = #tpu.dot_dimension_numbers<[1], [0], [0], [1], [0, 0, 1, 1], [], []>} : vector<8x8xf32>, vector<8x128xf32>, vector<8x128xf32> -> vector<8x128xf32>
    %c0_20 = arith.constant 0 : index
    %c0_21 = arith.constant 0 : index
    %25 = vector.load %arg12[%c0_20, %c0_21] : memref<8x128xf32, #tpu.memory_space<vmem>>, vector<8x128xf32>
    tpu.vector_store %arg12[%c0_20, %c0_21], %24 {strides = array<i32>} : memref<8x128xf32, #tpu.memory_space<vmem>>, vector<8x128xf32>,
    %c21 = arith.constant 21 : index
    %c0_22 = arith.constant 0 : index
    %26 = vector.load %arg6[%c21, %c0_22] : memref<29x128xf32, #tpu.memory_space<vmem>>, vector<8x128xf32>
    %cst_23 = arith.constant dense<0.000000e+00> : vector<8x128xf32>
    %27 = tpu.matmul %0, %26, %cst_23 {dimension_numbers = #tpu.dot_dimension_numbers<[1], [0], [0], [1], [0, 0, 1, 1], [], []>} : vector<8x8xf32>, vector<8x128xf32>, vector<8x128xf32> -> vector<8x128xf32>
    %c0_24 = arith.constant 0 : index
    %c0_25 = arith.constant 0 : index
    %28 = vector.load %arg2[%c0_24, %c0_25] : memref<8x128xf32, #tpu.memory_space<vmem>>, vector<8x128xf32>
    %29 = vector.broadcast %1 : vector<1x128xf32> to vector<8x128xf32>
    %30 = arith.subf %28, %29 : vector<8x128xf32>
    %31 = arith.subf %30, %9 : vector<8x128xf32>
    %32 = arith.subf %31, %18 : vector<8x128xf32>
    %33 = arith.subf %32, %21 : vector<8x128xf32>
    %34 = arith.mulf %33, %27 : vector<8x128xf32>
    %c0_26 = arith.constant 0 : index
    %c0_27 = arith.constant 0 : index
    %35 = vector.load %arg10[%c0_26, %c0_27] : memref<8x128xf32, #tpu.memory_space<vmem>>, vector<8x128xf32>
    tpu.vector_store %arg10[%c0_26, %c0_27], %34 {strides = array<i32>} : memref<8x128xf32, #tpu.memory_space<vmem>>, vector<8x128xf32>,
    %36 = vector.broadcast %1 : vector<1x128xf32> to vector<8x128xf32>
    %37 = arith.addf %36, %34 : vector<8x128xf32>
    %c0_28 = arith.constant 0 : index
    %c0_29 = arith.constant 0 : index
    %38 = vector.load %arg7[%c0_28, %c0_29] : memref<8x128xf32, #tpu.memory_space<vmem>>, vector<8x128xf32>
    tpu.vector_store %arg7[%c0_28, %c0_29], %37 {strides = array<i32>} : memref<8x128xf32, #tpu.memory_space<vmem>>, vector<8x128xf32>,
    return
  }
  func.func @transform_0(%arg0: i32, %arg1: i32) -> (i32, i32) {
    %c0_i32 = arith.constant 0 : i32
    return %arg0, %arg1 : i32, i32
  }
  func.func @transform_1(%arg0: i32, %arg1: i32) -> (i32, i32) {
    %c0_i32 = arith.constant 0 : i32
    %c0_i32_0 = arith.constant 0 : i32
    return %arg0, %c0_i32 : i32, i32
  }
  func.func @transform_2(%arg0: i32, %arg1: i32) -> (i32, i32) {
    %c0_i32 = arith.constant 0 : i32
    %c0_i32_0 = arith.constant 0 : i32
    return %arg0, %c0_i32 : i32, i32
  }
  func.func @transform_3(%arg0: i32, %arg1: i32) -> (i32, i32) {
    %c0_i32 = arith.constant 0 : i32
    %c0_i32_0 = arith.constant 0 : i32
    return %arg0, %c0_i32 : i32, i32
  }
  func.func @transform_4(%arg0: i32, %arg1: i32) -> (i32, i32) {
    %c0_i32 = arith.constant 0 : i32
    %c0_i32_0 = arith.constant 0 : i32
    return %c0_i32, %arg1 : i32, i32
  }
  func.func @transform_5(%arg0: i32, %arg1: i32) -> (i32, i32) {
    %c0_i32 = arith.constant 0 : i32
    return %arg0, %arg1 : i32, i32
  }
  func.func @transform_6(%arg0: i32, %arg1: i32) -> (i32, i32) {
    %c0_i32 = arith.constant 0 : i32
    return %arg0, %arg1 : i32, i32
  }
  func.func @transform_7(%arg0: i32, %arg1: i32) -> (i32, i32) {
    %c0_i32 = arith.constant 0 : i32
    return %arg0, %arg1 : i32, i32
  }
  func.func @transform_8(%arg0: i32, %arg1: i32) -> (i32, i32) {
    %c0_i32 = arith.constant 0 : i32
    return %arg0, %arg1 : i32, i32
  }
  func.func @transform_9(%arg0: i32, %arg1: i32) -> (i32, i32) {
    %c0_i32 = arith.constant 0 : i32
    return %arg0, %arg1 : i32, i32
  }
  func.func @transform_10(%arg0: i32, %arg1: i32) -> (i32, i32) {
    %c0_i32 = arith.constant 0 : i32
    return %arg0, %arg1 : i32, i32
  }
}

</mosaic_0001>

<bundles_post_ra>
// kernel: tpu_custom_call.1
= control target key start
LH: loop header
LB: loop body
LE: loop exit
PB: predicated region body
PF: predicated region fallthrough
CT: control target
= control target key end

     0   :  { %s2122_s0 = inlined_call_operand.vmem [shape: f32[8,256], index: 0, kind: input, shape index: {}]   ;;  %s2123_s1 = inlined_call_operand.vmem [shape: f32[8,1], index: 1, kind: input, shape index: {}]   ;;  %s2124_s2 = inlined_call_operand.vmem [shape: f32[8,1], index: 2, kind: input, shape index: {}]   ;;  %s2125_s3 = inlined_call_operand.hbm [shape: f32[8,8], index: 3, kind: input, shape index: {}]   ;;  %s2126_s4 = inlined_call_operand.hbm [shape: f32[29,256], index: 4, kind: input, shape index: {}]   ;;  %s2127_s5 = inlined_call_operand.hbm [shape: f32[8,256], index: 5, kind: output, shape index: {0}]   ;;  %s2128_s6 = inlined_call_operand.hbm [shape: f32[8,256], index: 6, kind: output, shape index: {1}]   ;;  %s2129_s7 = inlined_call_operand.hbm [shape: f32[8,256], index: 7, kind: output, shape index: {2}]   ;;  %s2130_s8 = inlined_call_operand.hbm [shape: f32[8,256], index: 8, kind: output, shape index: {3}]   ;;  %s2131_s9 = inlined_call_operand.hbm [shape: f32[8,256], index: 9, kind: output, shape index: {4}]   ;;  %s2132_s10 = inlined_call_operand.hbm [shape: f32[8,256], index: 10, kind: output, shape index: {5}]  }
   0x1   :  { %2148 = sst [smem:[#allocation26_spill]] %s2122_s0 }
   0x2   :  { %2149 = sst [smem:[#allocation27_spill]] %s2123_s1 }
   0x3   :  { %2150 = sst [smem:[#allocation28_spill]] %s2124_s2 }
   0x4   :  { %2151 = sst [smem:[#allocation29_spill]] %s2125_s3 }
   0x5   :  { %2152 = sst [smem:[#allocation30_spill]] %s2126_s4 }
   0x6   :  { %2153 = sst [smem:[#allocation31_spill]] %s2127_s5 }
   0x7   :  { %2154 = sst [smem:[#allocation32_spill]] %s2128_s6 }
   0x8   :  { %2155 = sst [smem:[#allocation33_spill]] %s2130_s8 }
   0x9   :  { %2156 = sst [smem:[#allocation34_spill]] %s2131_s9 }
   0xa   :  { %16 = vsyncpa [#allocation3], 0 }
   0xb   :  { %17 = vsyncpa [#allocation6], 0 }
   0xc   :  { %19 = vsyncpa [#allocation6 + $0x1], 0 }
   0xd   :  { %20 = vsyncpa [#allocation4], 0 }
   0xe   :  { %22 = vsyncpa [#allocation4 + $0x1], 0 }
   0xf   :  { %23 = vsyncpa [#allocation9], 0 }
  0x10   :  { %25 = vsyncpa [#allocation9 + $0x1], 0 }
  0x11   :  { %26 = vsyncpa [#allocation12], 0 }
  0x12   :  { %28 = vsyncpa [#allocation12 + $0x1], 0 }
  0x13   :  { %29 = vsyncpa [#allocation15], 0 }
  0x14   :  { %31 = vsyncpa [#allocation15 + $0x1], 0  ;;  %s1743_s13 = smov 0   ;;  %s1745_s14 = smov 0  }
  0x15   :  { %s1747_s15 = smov 0   ;;  %s1749_s16 = smov 0  }
  0x16   :  { %s1751_s17 = smov 0   ;;  %s1753_s18 = smov 0  }
  0x17 LB: > { %2157 = sst [smem:[#allocation22_spill]] %s1652_s13  ;;  %s1774_s19 = sadd.s32 4294967295, %s1672_s18   ;;  %s1672_s18 = sphi %s1753_s18, %s37_s18   ;;  %s1668_s17 = sphi %s1751_s17, %s2196_s17   ;;  %s1664_s16 = sphi %s1749_s16, %s2195_s16   ;;  %s1660_s15 = sphi %s1747_s15, %s2194_s15   ;;  %s1656_s14 = sphi %s1745_s14, %s2193_s14   ;;  %s1652_s13 = sphi %s1743_s13, %s2192_s13  }
  0x18   : > { %2158 = sst [smem:[#allocation23_spill]] %s1672_s18  ;;  %s2135_s20 = sadd.s32 4294967294, %s1672_s18  }
  0x19   : > { %p169_p0 = scmp.ne.s32.totalorder %s1660_s15, %s1656_s14  ;;  %p170_p1 = scmp.eq.s32.totalorder %s1672_s18, 0 }
  0x1a   : > { %p175_p2 = scmp.ne.s32.totalorder %s1656_s14, %s1652_s13  ;;  %p176_p3 = scmp.eq.s32.totalorder %s1774_s19, 0 }
  0x1b   : > { %p201_p4 = scmp.eq.s32.totalorder %s1774_s19, 1  ;;  %p1785_p5 = por %p170_p1, %p169_p0 }
  0x1c   : > { %p207_p6 = scmp.eq.s32.totalorder %s2135_s20, 1  ;;  %p1793_p7 = por %p176_p3, %p175_p2 }
  0x1d   : > { %p1797_p8 = por %p201_p4, %p169_p0  ;;  %p1227_p10 = scmp.ge.s32.totalorder %s1672_s18, 1 }
  0x1e   : > { %s2160_s23 = scalar_select %p1793_p7, 1, 0 }
  0x1f   : > { %s2161_s24 = scalar_select %p1797_p8, 1, 0 }
  0x20   : > { %p1801_p9 = por %p207_p6, %p175_p2  ;;  %p354_p11 = scmp.lt.s32.totalorder %s1672_s18, 3 }
  0x21   : > { %s1674_s27 = smov [#allocation2]   ;;  %p1333_p1 = scmp.lt.s32.totalorder %s1672_s18, 2 }
  0x22   : > { %s2162_s25 = scalar_select %p1801_p9, 1, 0 }
  0x23   : > { %p1808_p13 = pnand %p1227_p10, %p354_p11  ;;  %s383_s28 = sshll.u32 %s1674_s27, 4  ;;  %s384_s28 = int_to_ptr.vmem [resolvable:$true] %s383_s28 }
  0x24   : > { %2163 = sst [smem:[#allocation24_spill]] %s2162_s25  ;;  %p1817_p4 = pnand %p1333_p1, %p1785_p5 }
  0x25   : > { %p1305_p0 = pneg %p1808_p13  ;;  %s46_s11 = sadd.s32 1, %s1668_s17 }
  0x26   : > { %p47_p6 = scmp.ge.s32.totalorder %s46_s11, 2  ;;  %s405_s12 = sand.u32 1, %s1660_s15  }
  0x27   : > { %p1823_p2 = pnand %p1305_p0, %p176_p3  ;;  %s1403_s27 = scalar_lea.vmem %s384_s28, 128 }
  0x28   : > { %p1404_p11 = scmp.ne.s32.totalorder %s384_s28, %s1403_s27  ;;  %p1411_p8 = scmp.lt.s32.totalorder %s384_s28, %s384_s28 }
  0x29   : > { %p1394_p10 = pneg %p1823_p2  ;;  %p1412_p5 = scmp.lt.s32.totalorder %s1403_s27, %s1403_s27 }
  0x2b   : > { %p1406_p12 = pnand %p1404_p11, %p1394_p10  ;;  %p1413_p1 = por %p1412_p5, %p1411_p8 }
  0x2d   : > { %p1407_p9 = pneg %p1406_p12 }
  0x2f   : > { %p1414_p7 = pnand %p1413_p1, %p1407_p9 }
  0x31   : > { %1417 = shalt.err (!%p1414_p7)
}
  0x32   : > { %s2167_s3 = sld [smem:[#allocation29_spill]]  ;;  %s2198_s11 = smov (%p47_p6, %s46_s11), 0 }
  0x33   : > { %2168 = sst [smem:[#allocation25_spill]] %s2198_s11  ;;  %s1232_s21 = sshll.u32 %s405_s12, 5 }
  0x34   : > { %s159_s18 = ssub.s32 %s1668_s17, %s2198_s11  ;;  %s1233_s27 = sshll.u32 %s1668_s17, 7 }
  0x35   : > { %p160_p12 = scmp.eq.s32.totalorder %s159_s18, 0  ;;  %s2169_s4 = sld [smem:[#allocation30_spill]] }
  0x36   : > { %s409_s5 = scalar_lea.vmem [#allocation5], %s1232_s21  ;;  %s2170_s20 = sadd.s32 1, %s1660_s15 }
  0x37   : > { %s415_s9 = sshll.u32 %s409_s5, 4  ;;  %s406_s8 = scalar_lea.sflag [#allocation6], %s405_s12  ;;  %s416_s9 = int_to_ptr.vmem [resolvable:$true] %s415_s9 }
  0x38   : > { %1308 = dma.hbm_to_vmem [thread:$0]  (!%p1823_p2), %s2167_s3, 128, %s384_s28, [#allocation3]  }
  0x39   : > { %s1847_s22 = scalar_select %p160_p12, %s1660_s15, %s2170_s20  }
  0x3a   : > { %p1420_p7 = pneg %p1817_p4  ;;  %s1431_s28 = scalar_lea.vmem %s416_s9, 512 }
  0x3b   : > { %s414_s30 = scalar_lea.hbm %s2169_s4, %s1233_s27  ;;  %p1432_p8 = scmp.ne.s32.totalorder %s416_s9, %s1431_s28 }
  0x3c   : > { %s1675_s3 = smov [#allocation5]  }
  0x3d   : > { %p1434_p9 = pnand %p1432_p8, %p1420_p7  ;;  %s1436_s18 = sshll.u32 %s1675_s3, 4  ;;  %s1437_s18 = int_to_ptr.vmem [resolvable:$false] %s1436_s18 }
  0x3e   : > { %s1438_s11 = scalar_lea.vmem %s1437_s18, 1024  ;;  %p1439_p2 = scmp.lt.s32.totalorder %s416_s9, %s1437_s18 }
  0x3f   : > { %p1435_p0 = pneg %p1434_p9  ;;  %p1440_p6 = scmp.lt.s32.totalorder %s1438_s11, %s1431_s28 }
  0x41   : > { %p1441_p10 = por %p1440_p6, %p1439_p2 }
  0x43   : > { %p1442_p11 = pnand %p1441_p10, %p1435_p0 }
  0x45   : > { %1445 = shalt.err (!%p1442_p11)
}
  0x46   : > { %s1676_s5 = smov 256   ;;  %s1677_s13 = smov 128  }
  0x47   : > { %s1678_s21 = smov 8   ;;  %427 = sbr.rel (%p1808_p13) target bundleno = 365 (0x16d), region = 40 }
  0x48   : > { %1312 = dma.hbm_to_vmem [thread:$0]  (!%p1817_p4), %s414_s30, 512, %s416_s9, %s406_s8, %s1676_s5, %s1677_s13, %s1678_s21  }
  0x4c   : > { %1627 = dma.done.wait (%p176_p3), [#allocation3], 128  }
  0x4d   : > { %1629 = vsyncadd (%p176_p3), [#allocation3], 4294967168  ;;  %s1860_s3 = sand.u32 1, %s1656_s14   ;;  %p2171_p4 = scmp.ne.s32.totalorder %s2160_s23, 0 }
  0x4e   : > { %s1236_s25 = sshll.u32 %s1860_s3, 5  ;;  %s434_s11 = scalar_lea.sflag [#allocation6], %s1860_s3 }
  0x4f   : > { %s1864_s12 = scalar_lea.vmem [#allocation5], %s1236_s25 }
  0x50   : > { %1631 = dma.done.wait (%p2171_p4), %s434_s11, 512  }
  0x51   : > { %1633 = vsyncadd (%p2171_p4), %s434_s11, 4294966784  ;;  %v1679_v0 = vmov 0.0   ;;  %vm1680_vm0 = vmmov 0   ;;  %v1681_v1 = vmov 0   ;;  %vm572_vm1 = vcmask 64512   ;;  %v571_v2 = vld [vmem:[%s1864_s12 + $0x5] sm:$0xff] }
  0x52   : > { %1272 = vmatprep.subr.mxu0 %v1679_v0  ;;  %1274 = vmatprep.mubr.msk.f32.mxu0 %vm1680_vm0, %v1679_v0  ;;  %v531_v3 = vld [vmem:[#allocation2] sm:$0xff]  ;;  %v647_v5 = vld [vmem:[%s1864_s12 + $0xd] sm:$0xff]  ;;  %s2172_s1 = sld [smem:[#allocation27_spill]]  ;;  %s1883_s29 = sshll.u32 %s1860_s3, 3  ;;  %v1244_v8 = vld [vmem:[%s1864_s12 + $0x1] ss:$0 sm:$0xff] }
  0x53   : > { %1277 = vmatprep.subr.mxu1 %v1679_v0  ;;  %1279 = vmatprep.mubr.msk.f32.mxu1 %vm1680_vm0, %v1679_v0  ;;  %v719_v4 = vld [vmem:[%s1864_s12 + $0x15] sm:$0xff]  ;;  %s2173_s2 = sld [smem:[#allocation28_spill]]  ;;  %s2144_s27 = sand.u32 1, %s1774_s19   ;;  %v1245_v9 = vld [vmem:[%s1864_s12 + $0x2] ss:$0 sm:$0xff] }
  0x54   : > { %1391 = vset.pattern.permute.xlu0 %v1681_v1  ;;  %1273 = vmatpush3.msra.mxu0 %v571_v2  ;;  %s1889_s30 = sshll.u32 %s1664_s16, 7  ;;  %s486_s20 = scalar_lea.vmem [#allocation8], %s1883_s29  ;;  %v1246_v12 = vld [vmem:[%s1864_s12 + $0x3] ss:$0 sm:$0xff]  ;;  %v1247_v14 = vld [vmem:[%s1864_s12 + $0x4] ss:$0 sm:$0xff] }
  0x55   : > { %1275 = vmatmul.mubr.msk.f32.vlgmr.msra.gmra.mxu0 %vm572_vm1, %v531_v3  ;;  %1282 = vmatprep.subr.mxu0 %v1679_v0  ;;  %s859_s28 = sshll.u32 %s486_s20, 4  ;;  %s2174_s6 = sld [smem:[#allocation32_spill]]  ;;  %s1901_s28 = int_to_ptr.vmem [resolvable:$true] %s859_s28 }
  0x56   : > { %1283 = vmatpush3.msra.mxu0 %v719_v4  ;;  %1284 = vmatprep.mubr.msk.f32.mxu0 %vm1680_vm0, %v1679_v0  ;;  %s2145_s21 = scalar_lea.vmem [#allocation10], %s1883_s29  ;;  %s1912_s11 = scalar_lea.sflag [#allocation9], %s2144_s27 }
  0x57   : > { %1278 = vmatpush3.msra.mxu1 %v647_v5  ;;  %s1907_s25 = sshll.u32 %s2145_s21, 4  ;;  %s1446_s8 = scalar_lea.vmem %s1901_s28, 128  ;;  %s875_s25 = int_to_ptr.vmem [resolvable:$true] %s1907_s25 }
  0x58   : > { %v533_v6 = vld [vmem:[%s2172_s1] sm:$0xff]  ;;  %1280 = vmatmul.mubr.msk.f32.vlgmr.msra.gmra.mxu1 %vm572_vm1, %v531_v3  ;;  %p1447_p3 = scmp.ne.s32.totalorder %s1901_s28, %s1446_s8  ;;  %p2175_p13 = scmp.ne.s32.totalorder %s2161_s24, 0 }
  0x59   : > { %537 = vperm.xlu0 %1391, %v533_v6   ;;  %v552_v7 = vld [vmem:[%s2173_s2] sm:$0xff]  ;;  %1285 = vmatmul.mubr.msk.f32.vlgmr.msra.gmra.mxu0 %vm572_vm1, %v531_v3  ;;  %s1682_s9 = smov [#allocation8]  }
  0x5a   : > { %p1448_p5 = pnand %p1447_p3, %p2175_p13  ;;  %s1450_s23 = sshll.u32 %s1682_s9, 4  ;;  %s1451_s23 = int_to_ptr.vmem [resolvable:$false] %s1450_s23 }
  0x5b   : > { %s1899_s13 = scalar_lea.hbm %s2174_s6, %s1889_s30  ;;  %s1452_s26 = scalar_lea.vmem %s1451_s23, 256 }
  0x5c   : > { %p1449_p1 = pneg %p1448_p5  ;;  %p1453_p12 = scmp.lt.s32.totalorder %s1901_s28, %s1451_s23 }
  0x5d   : > { %556 = vperm.xlu0 %1391, %v552_v7   ;;  %p1454_p7 = scmp.lt.s32.totalorder %s1452_s26, %s1446_s8 }
  0x5f   : > { %p1455_p8 = por %p1454_p7, %p1453_p12 }
  0x61   : > { %p1456_p9 = pnand %p1455_p8, %p1449_p1 }
  0xd4   : > { %v538_v10 = vpop.permute.xlu0 %537 }
  0xd5   : > { %v544_v11 = vmul.f32 %v1244_v8, %v538_v10 }
  0xd7   : > { %v1893_v13 = vadd.f32 %v1245_v9, %v544_v11 }
  0xd8   : > { %v557_v15 = vpop.permute.xlu0 %556 }
  0xd9   : > { %v563_v16 = vmul.f32 %v1246_v12, %v557_v15  ;;  %551 = vst [vmem:[%s486_s20] sm:$0xff] %v1893_v13 }
  0xda   : > { %1459 = shalt.err (!%p1456_p9)
}
  0xdb   : > { %s1460_s20 = scalar_lea.hbm %s1899_s13, 128  ;;  %s1464_s9 = scalar_lea.hbm %s2174_s6, 256 }
  0xdc   : > { %p1461_p0 = scmp.ne.s32.totalorder %s1899_s13, %s1460_s20  ;;  %p1465_p10 = scmp.lt.s32.totalorder %s1899_s13, %s2174_s6 }
  0xdd   : > { %p1466_p11 = scmp.lt.s32.totalorder %s1464_s9, %s1460_s20 }
  0xde   : > { %p1462_p2 = pnand %p1461_p0, %p2175_p13 }
  0xdf   : > { %p1467_p4 = por %p1466_p11, %p1465_p10 }
  0xe0   : > { %p1463_p6 = pneg %p1462_p2 }
  0xe2   : > { %p1468_p3 = pnand %p1467_p4, %p1463_p6 }
  0xe4   : > { %1471 = shalt.err (!%p1468_p3)
}
  0xe5   : > { %1294 = dma.vmem_to_hbm [thread:$0]  (%p2175_p13), %s1901_s28, 128, %s1899_s13, %s1912_s11   ;;  %v569_v17 = vadd.f32 %v1247_v14, %v563_v16 }
  0xe6   : > { %s872_s27 = scalar_lea.hbm %s2129_s7, %s1889_s30  ;;  %s2176_s21 = scalar_lea.vmem [#allocation10], %s1883_s29 }
  0xe7   : > { %570 = vst [vmem:[%s2176_s21] sm:$0xff] %v569_v17  ;;  %s1472_s26 = scalar_lea.vmem %s875_s25, 128  ;;  %s1683_s20 = smov [#allocation10]  }
  0xe8   : > { %p1473_p5 = scmp.ne.s32.totalorder %s875_s25, %s1472_s26  ;;  %s1476_s18 = sshll.u32 %s1683_s20, 4  ;;  %s1477_s18 = int_to_ptr.vmem [resolvable:$false] %s1476_s18 }
  0xe9   : > { %s1478_s5 = scalar_lea.vmem %s1477_s18, 256  ;;  %p1479_p7 = scmp.lt.s32.totalorder %s875_s25, %s1477_s18 }
  0xea   : > { %p1474_p1 = pnand %p1473_p5, %p2175_p13  ;;  %p1480_p8 = scmp.lt.s32.totalorder %s1478_s5, %s1472_s26 }
  0xec   : > { %p1475_p12 = pneg %p1474_p1  ;;  %p1481_p9 = por %p1480_p8, %p1479_p7 }
  0xee   : > { %p1482_p0 = pnand %p1481_p9, %p1475_p12 }
  0xf0   : > { %1485 = shalt.err (!%p1482_p0)
}
  0xf1   : > { %s1486_s28 = scalar_lea.hbm %s872_s27, 128  ;;  %s1490_s8 = scalar_lea.hbm %s2129_s7, 256 }
  0xf2   : > { %p1487_p2 = scmp.ne.s32.totalorder %s872_s27, %s1486_s28  ;;  %p1491_p11 = scmp.lt.s32.totalorder %s872_s27, %s2129_s7 }
  0xf3   : > { %p1492_p4 = scmp.lt.s32.totalorder %s1490_s8, %s1486_s28 }
  0xf4   : > { %p1488_p6 = pnand %p1487_p2, %p2175_p13 }
  0xf5   : > { %p1493_p3 = por %p1492_p4, %p1491_p11 }
  0xf6   : > { %p1489_p10 = pneg %p1488_p6 }
  0xf8   : > { %p1494_p5 = pnand %p1493_p3, %p1489_p10 }
  0xfa   : > { %1497 = shalt.err (!%p1494_p5)
}
  0xfb   : > { %1295 = dma.vmem_to_hbm [thread:$0]  (%p2175_p13), %s875_s25, 128, %s872_s27, %s1912_s11   ;;  %v1251_v19 = vld [vmem:[%s1864_s12] ss:$0 sm:$0xff] }
  0xfc   : > { %p517_p1 = scmp.lt.s32.totalorder %s1664_s16, 1  ;;  %s2177_s0 = sld [smem:[#allocation26_spill]] }
  0xfd   : > { %s507_s28 = scalar_lea.vmem [#allocation13], %s1883_s29  ;;  %s514_s9 = scalar_lea.vmem [#allocation14], %s1883_s29 }
  0xfe   : > { %s2200_s16 = smov (!%p517_p1, %s1664_s16), 1  ;;  %s904_s13 = sshll.u32 %s507_s28, 4  ;;  %s1964_s13 = int_to_ptr.vmem [resolvable:$true] %s904_s13 }
  0xff   : > { %s1243_s26 = sshll.u32 %s2200_s16, 3  ;;  %s919_s25 = sshll.u32 %s514_s9, 4  ;;  %s1966_s25 = int_to_ptr.vmem [resolvable:$true] %s919_s25 }
 0x100   : > { %s2147_s16 = scalar_lea.vmem [#allocation11], %s1883_s29  ;;  %s1975_s8 = scalar_lea.hbm %s2132_s10, %s1889_s30 }
 0x101   : > { %s889_s12 = sshll.u32 %s2147_s16, 4  ;;  %s2146_s18 = scalar_lea.vmem [#allocation7], %s1883_s29  ;;  %s1983_s12 = int_to_ptr.vmem [resolvable:$true] %s889_s12 }
 0x102   : > { %s522_s5 = scalar_lea.vmem %s2177_s0, %s1243_s26  ;;  %s2178_s26 = sld [smem:[#allocation33_spill]] }
 0x103   : > { %v790_v18 = vld [vmem:[%s522_s5] sm:$0xff]  ;;  %s1988_s5 = sshll.u32 %s2146_s18, 4  ;;  %s1498_s11 = scalar_lea.vmem %s1966_s25, 128  ;;  %s2026_s5 = int_to_ptr.vmem [resolvable:$true] %s1988_s5 }
 0x104   : > { %v795_v20 = vsub.f32 %v790_v18, %v1251_v19  ;;  %p1499_p12 = scmp.ne.s32.totalorder %s1966_s25, %s1498_s11  ;;  %s1684_s27 = smov [#allocation14]  }
 0x105   : > { %s1502_s23 = sshll.u32 %s1684_s27, 4  ;;  %s1503_s23 = int_to_ptr.vmem [resolvable:$false] %s1502_s23 }
 0x106   : > { %v796_v21 = vsub.f32 %v795_v20, %v1893_v13  ;;  %p1500_p7 = pnand %p1499_p12, %p2175_p13  ;;  %s1504_s21 = scalar_lea.vmem %s1503_s23, 256 }
 0x107   : > { %p1505_p9 = scmp.lt.s32.totalorder %s1966_s25, %s1503_s23  ;;  %p1506_p0 = scmp.lt.s32.totalorder %s1504_s21, %s1498_s11 }
 0x108   : > { %v797_v23 = vsub.f32 %v796_v21, %v569_v17  ;;  %s1981_s20 = scalar_lea.hbm %s2178_s26, %s1889_s30  ;;  %p1501_p8 = pneg %p1500_p7 }
 0x109   : > { %p1507_p2 = por %p1506_p0, %p1505_p9 }
 0x10b   : > { %p1508_p6 = pnand %p1507_p2, %p1501_p8 }
 0x115   : > { %v642_v22 = vpop.f32.mrf.mxu0 }
 0x116   : > { %646 = vst [vmem:[%s507_s28] sm:$0xff] %v642_v22  ;;  %v798_v25 = vsub.f32 %v797_v23, %v642_v22  ;;  %s829_s28 = scalar_lea.sflag [#allocation15], %s1860_s3 }
 0x117   : > { %v1276_v24 = vpop.f32.mrf.mxu0 }
 0x118   : > { %v714_v26 = vpop.f32.mrf.mxu1 }
 0x119   : > { %v786_v27 = vpop.f32.mrf.mxu0  ;;  %718 = vst [vmem:[%s514_s9] sm:$0xff] %v714_v26 }
 0x11a   : > { %v799_v28 = vmul.f32 %v798_v25, %v786_v27  ;;  %v1281_v29 = vpop.f32.mrf.mxu1 }
 0x11b   : > { %1511 = shalt.err (!%p1508_p6)
}
 0x11c   : > { %s1512_s9 = scalar_lea.hbm %s1975_s8, 128  ;;  %s1516_s27 = scalar_lea.hbm %s2132_s10, 256 }
 0x11d   : > { %p1513_p10 = scmp.ne.s32.totalorder %s1975_s8, %s1512_s9  ;;  %p1517_p3 = scmp.lt.s32.totalorder %s1975_s8, %s2132_s10 }
 0x11e   : > { %p1518_p5 = scmp.lt.s32.totalorder %s1516_s27, %s1512_s9 }
 0x11f   : > { %p1514_p11 = pnand %p1513_p10, %p2175_p13 }
 0x120   : > { %p1519_p1 = por %p1518_p5, %p1517_p3 }
 0x121   : > { %p1515_p4 = pneg %p1514_p11 }
 0x123   : > { %p1520_p12 = pnand %p1519_p1, %p1515_p4 }
 0x125   : > { %1523 = shalt.err (!%p1520_p12)
}
 0x126   : > { %1298 = dma.vmem_to_hbm [thread:$0]  (%p2175_p13), %s1966_s25, 128, %s1975_s8, %s829_s28   ;;  %v1286_v30 = vpop.f32.mrf.mxu0  ;;  %v801_v31 = vadd.f32 %v1251_v19, %v799_v28 }
 0x127   : > { %s2179_s16 = sld [smem:[#allocation34_spill]]  ;;  %s2181_s23 = scalar_lea.vmem [#allocation11], %s1883_s29 }
 0x128   : > { %800 = vst [vmem:[%s2181_s23] sm:$0xff] %v799_v28  ;;  %s2182_s27 = sld [smem:[#allocation31_spill]]  ;;  %s2183_s4 = sand.u32 1, %s1774_s19  }
 0x129   : > { %s2030_s6 = scalar_lea.sflag [#allocation12], %s2183_s4  ;;  %s1524_s25 = scalar_lea.vmem %s1983_s12, 128 }
 0x12a   : > { %p1525_p7 = scmp.ne.s32.totalorder %s1983_s12, %s1524_s25  ;;  %s1685_s8 = smov [#allocation11]  }
 0x12b   : > { %s1528_s28 = sshll.u32 %s1685_s8, 4  ;;  %s1529_s28 = int_to_ptr.vmem [resolvable:$false] %s1528_s28 }
 0x12c   : > { %p1526_p8 = pnand %p1525_p7, %p2175_p13  ;;  %s1530_s0 = scalar_lea.vmem %s1529_s28, 256 }
 0x12d   : > { %s2180_s11 = smov %s2179_s16  ;;  %s2015_s18 = scalar_lea.hbm %s2179_s16, %s1889_s30 }
 0x12e   : > { %s2023_s2 = scalar_lea.hbm %s2182_s27, %s1889_s30  ;;  %p1527_p9 = pneg %p1526_p8 }
 0x12f   : > { %p1531_p0 = scmp.lt.s32.totalorder %s1983_s12, %s1529_s28  ;;  %p1532_p2 = scmp.lt.s32.totalorder %s1530_s0, %s1524_s25 }
 0x131   : > { %p1533_p6 = por %p1532_p2, %p1531_p0 }
 0x133   : > { %p1534_p10 = pnand %p1533_p6, %p1527_p9 }
 0x135   : > { %1537 = shalt.err (!%p1534_p10)
}
 0x136   : > { %s1538_s4 = scalar_lea.hbm %s1981_s20, 128  ;;  %s1542_s1 = scalar_lea.hbm %s2178_s26, 256 }
 0x137   : > { %p1539_p11 = scmp.ne.s32.totalorder %s1981_s20, %s1538_s4  ;;  %p1543_p5 = scmp.lt.s32.totalorder %s1981_s20, %s2178_s26 }
 0x138   : > { %p1544_p1 = scmp.lt.s32.totalorder %s1542_s1, %s1538_s4 }
 0x139   : > { %p1540_p4 = pnand %p1539_p11, %p2175_p13 }
 0x13a   : > { %p1545_p12 = por %p1544_p1, %p1543_p5 }
 0x13b   : > { %p1541_p3 = pneg %p1540_p4 }
 0x13d   : > { %p1546_p7 = pnand %p1545_p12, %p1541_p3 }
 0x13f   : > { %1549 = shalt.err (!%p1546_p7)
}
 0x140   : > { %1296 = dma.vmem_to_hbm [thread:$0]  (%p2175_p13), %s1983_s12, 128, %s1981_s20, %s2030_s6  }
 0x141   : > { %s2184_s21 = scalar_lea.vmem [#allocation7], %s1883_s29  ;;  %s1550_s9 = scalar_lea.vmem %s1964_s13, 128 }
 0x142   : > { %802 = vst [vmem:[%s2184_s21] sm:$0xff] %v801_v31  ;;  %p1551_p8 = scmp.ne.s32.totalorder %s1964_s13, %s1550_s9  ;;  %s1686_s25 = smov [#allocation13]  }
 0x143   : > { %s1554_s8 = sshll.u32 %s1686_s25, 4  ;;  %s1555_s8 = int_to_ptr.vmem [resolvable:$false] %s1554_s8 }
 0x144   : > { %p1552_p9 = pnand %p1551_p8, %p2175_p13  ;;  %s1556_s28 = scalar_lea.vmem %s1555_s8, 256 }
 0x145   : > { %p1557_p2 = scmp.lt.s32.totalorder %s1964_s13, %s1555_s8  ;;  %p1558_p6 = scmp.lt.s32.totalorder %s1556_s28, %s1550_s9 }
 0x146   : > { %p1553_p0 = pneg %p1552_p9 }
 0x147   : > { %p1559_p10 = por %p1558_p6, %p1557_p2 }
 0x149   : > { %p1560_p11 = pnand %p1559_p10, %p1553_p0 }
 0x14b   : > { %1563 = shalt.err (!%p1560_p11)
}
 0x14c   : > { %s1564_s29 = scalar_lea.hbm %s2015_s18, 128  ;;  %s1568_s0 = scalar_lea.hbm %s2180_s11, 256 }
 0x14d   : > { %p1565_p4 = scmp.ne.s32.totalorder %s2015_s18, %s1564_s29  ;;  %p1569_p1 = scmp.lt.s32.totalorder %s2015_s18, %s2180_s11 }
 0x14e   : > { %p1570_p12 = scmp.lt.s32.totalorder %s1568_s0, %s1564_s29 }
 0x14f   : > { %p1566_p3 = pnand %p1565_p4, %p2175_p13 }
 0x150   : > { %p1571_p7 = por %p1570_p12, %p1569_p1 }
 0x151   : > { %p1567_p5 = pneg %p1566_p3 }
 0x153   : > { %p1572_p8 = pnand %p1571_p7, %p1567_p5 }
 0x155   : > { %1575 = shalt.err (!%p1572_p8)
}
 0x156   : > { %1297 = dma.vmem_to_hbm [thread:$0]  (%p2175_p13), %s1964_s13, 128, %s2015_s18, %s2030_s6  }
 0x157   : > { %s804_s30 = scalar_lea.sflag [#allocation4], %s1860_s3  ;;  %s1576_s1 = scalar_lea.vmem %s2026_s5, 128 }
 0x158   : > { %p1577_p9 = scmp.ne.s32.totalorder %s2026_s5, %s1576_s1  ;;  %s1687_s16 = smov [#allocation7]  }
 0x159   : > { %s1580_s23 = sshll.u32 %s1687_s16, 4  ;;  %s1581_s23 = int_to_ptr.vmem [resolvable:$false] %s1580_s23 }
 0x15a   : > { %p1578_p0 = pnand %p1577_p9, %p2175_p13  ;;  %s1582_s21 = scalar_lea.vmem %s1581_s23, 256 }
 0x15b   : > { %p1583_p6 = scmp.lt.s32.totalorder %s2026_s5, %s1581_s23  ;;  %p1584_p10 = scmp.lt.s32.totalorder %s1582_s21, %s1576_s1 }
 0x15c   : > { %p1579_p2 = pneg %p1578_p0 }
 0x15d   : > { %p1585_p11 = por %p1584_p10, %p1583_p6 }
 0x15f   : > { %p1586_p4 = pnand %p1585_p11, %p1579_p2 }
 0x161   : > { %1589 = shalt.err (!%p1586_p4)
}
 0x162   : > { %s1590_s6 = scalar_lea.hbm %s2023_s2, 128  ;;  %s1594_s18 = scalar_lea.hbm %s2182_s27, 256 }
 0x163   : > { %p1591_p3 = scmp.ne.s32.totalorder %s2023_s2, %s1590_s6  ;;  %p1595_p12 = scmp.lt.s32.totalorder %s2023_s2, %s2182_s27 }
 0x164   : > { %p1596_p7 = scmp.lt.s32.totalorder %s1594_s18, %s1590_s6 }
 0x165   : > { %p1592_p5 = pnand %p1591_p3, %p2175_p13 }
 0x166   : > { %p1597_p8 = por %p1596_p7, %p1595_p12 }
 0x167   : > { %p1593_p1 = pneg %p1592_p5 }
 0x169   : > { %p1598_p9 = pnand %p1597_p8, %p1593_p1 }
 0x16b   : > { %1601 = shalt.err (!%p1598_p9)
}
 0x16c   : > { %1293 = dma.vmem_to_hbm [thread:$0]  (%p2175_p13), %s2026_s5, 128, %s2023_s2, %s804_s30  }
 0x16d PF: > { %s2185_s8 = sld [smem:[#allocation22_spill]] }
 0x16e   : > { %s2186_s28 = sld [smem:[#allocation24_spill]] }
 0x16f   : > { %s2187_s29 = sld [smem:[#allocation23_spill]] }
 0x173   : > { %s931_s12 = sand.u32 1, %s2185_s8  }
 0x174   : > { %p2188_p0 = scmp.ne.s32.totalorder %s2186_s28, 0  ;;  %s932_s20 = scalar_lea.sflag [#allocation4], %s931_s12 }
 0x175   : > { %p2189_p2 = scmp.ge.s32.totalorder %s2187_s29, 2 }
 0x177   : > { %p1314_p6 = pnand %p2189_p2, %p2188_p0 }
 0x179   : > { %p1315_p10 = pneg %p1314_p6 }
 0x17b   : > { %1635 = dma.done.wait (%p1315_p10), %s932_s20, 128  }
 0x17c   : > { %1637 = vsyncadd (%p1315_p10), %s932_s20, 4294967168  ;;  %s2190_s0 = sadd.s32 4294967294, %s2187_s29  }
 0x17d   : > { %s940_s4 = sand.u32 1, %s2190_s0  }
 0x17e   : > { %s941_s19 = scalar_lea.sflag [#allocation9], %s940_s4 }
 0x17f   : > { %1639 = dma.done.wait (%p1315_p10), %s941_s19, 256  }
 0x180   : > { %1641 = vsyncadd (%p1315_p10), %s941_s19, 4294967040  ;;  %s959_s24 = scalar_lea.sflag [#allocation12], %s940_s4 }
 0x181   : > { %1643 = dma.done.wait (%p1315_p10), %s959_s24, 256  }
 0x182   : > { %1645 = vsyncadd (%p1315_p10), %s959_s24, 4294967040  ;;  %s977_s2 = scalar_lea.sflag [#allocation15], %s931_s12 }
 0x183   : > { %1647 = dma.done.wait (%p1315_p10), %s977_s2, 128  }
 0x184   : > { %1649 = vsyncadd (%p1315_p10), %s977_s2, 4294967168  ;;  %s37_s18 = sadd.s32 1, %s2187_s29   ;;  %s2191_s5 = sld [smem:[#allocation25_spill]] }
 0x185   : > { %p34_p13 = scmp.ge.s32.totalorder %s37_s18, 4   ;;  %s2192_s13 = smov %s1656_s14 }
 0x186   : > { %s2193_s14 = smov %s1660_s15  ;;  %s2194_s15 = smov %s1847_s22 }
 0x187   : > { %s2195_s16 = smov %s1668_s17  ;;  %36 = sbr.rel (!%p34_p13) target bundleno = 23 (0x17), region = 181 }
 0x18a   : > { %s2196_s17 = smov %s2191_s5 }
 0x18c   :  { %982 = vsyncpa [#allocation3], 1 }
 0x18d   :  { %984 = vsyncpa [#allocation3 + $0x1], 1 }
 0x18e   :  { %985 = vsyncpa [#allocation6], 1 }
 0x18f   :  { %987 = vsyncpa [#allocation6 + $0x1], 1 }
 0x190   :  { %988 = vsyncpa [#allocation4], 1 }
 0x191   :  { %990 = vsyncpa [#allocation4 + $0x1], 1 }
 0x192   :  { %991 = vsyncpa [#allocation9], 1 }
 0x193   :  { %993 = vsyncpa [#allocation9 + $0x1], 1 }
 0x194   :  { %994 = vsyncpa [#allocation12], 1 }
 0x195   :  { %996 = vsyncpa [#allocation12 + $0x1], 1 }
 0x196   :  { %997 = vsyncpa [#allocation15], 1 }
 0x197   :  { %999 = vsyncpa [#allocation15 + $0x1], 1 }

</bundles_post_ra>
